<compile_context>
chip_gen: v5e
topology: v5e:2x2
jax: 0.10.0
libtpu: 0.0.40
codegen_flags: <defaults>
</compile_context>

<pallas_src>
import functools

import jax
import jax.numpy as jnp
from jax.experimental import pallas as pl
from jax.experimental.pallas import tpu as pltpu


# ----------------------------------------------------------------------------
# Parameter construction (glue, plain JAX)
# ----------------------------------------------------------------------------
def build_c4_regular_weight(psi):
    """Build a C_N-equivariant (regular->regular) conv weight from a base filter.

    psi: (out_fields, in_fields, N, k, k) base filter.  The full weight is
    obtained by rotating the filter spatially by s*90deg and cyclically
    permuting the input group axis (the group-convolution lift, a valid element
    of the e2cnn R2Conv weight space for C_4 regular representations).
    returns: (out_fields*N, in_fields*N, k, k) in OIHW order.
    """
    co, ci, n, k, _ = psi.shape
    assert n == 4, "exact 90-degree rotations require N=4"
    blocks = []
    for s in range(n):
        rot = jnp.rot90(psi, k=s, axes=(-2, -1))      # spatial rotation s*90deg
        perm = (jnp.arange(n) - s) % n                # input-group permutation
        blocks.append(rot[:, :, perm])                # (co, ci, n, k, k)
    w = jnp.stack(blocks, axis=1)                     # (co, s, ci, r, k, k)
    return w.reshape(co * n, ci * n, k, k)


# ----------------------------------------------------------------------------
# Helpers
# ----------------------------------------------------------------------------
def _round_up(x, m):
    return ((x + m - 1) // m) * m


def _pick_tile(total, cap=2048):
    """Largest spatial tile that divides `total`, is a multiple of 8, <= cap."""
    if total <= cap:
        return total
    for t in range(cap, 7, -1):
        if t % 8 == 0 and total % t == 0:
            return t
    return total  # full-extent block is always legal


def _vmem_limit_bytes():
    """Generation-aware VMEM limit (leave headroom for Mosaic scratch)."""
    try:
        cap = int(pltpu.get_tpu_info().vmem_capacity_bytes)
    except Exception:  # pragma: no cover - conservative fallback
        cap = 64 * 1024 * 1024
    return max(min(cap - 16 * 1024 * 1024, 100 * 1024 * 1024),
               32 * 1024 * 1024)


# ----------------------------------------------------------------------------
# Pass 1: conv (one folded MXU matmul) + bias + per-(batch,tile) BN partial sums
# ----------------------------------------------------------------------------
def conv_stats_kernel(p_ref, w_ref, bias_ref, y_ref, stats_ref):
    # p_ref: (tile_m, kkc_pad) bf16 im2col patches, w_ref: (kkc_pad, cpad) bf16
    acc = jnp.dot(p_ref[...], w_ref[...],
                  preferred_element_type=jnp.float32)      # (tile_m, cpad) f32
    y = acc + bias_ref[...]                                # per-channel bias
    y_ref[...] = y.astype(y_ref.dtype)                     # bf16 writeback

    # partial BN sums for this (batch, tile) block, computed in f32 before the
    # bf16 cast; reduced globally in the wrapper.
    # TODO(synk): one-pass E[x^2]-E[x]^2 can lose precision if |mean|^2 >> var;
    # a shifted/Welford formulation would need an extra pass over the data.
    s1 = jnp.sum(y, axis=0, keepdims=True)
    s2 = jnp.sum(y * y, axis=0, keepdims=True)
    stats_ref[...] = jnp.concatenate(
        [s1, s2, jnp.zeros((6, s1.shape[1]), jnp.float32)], axis=0)  # (8,cpad)


# ----------------------------------------------------------------------------
# Pass 2: pure fused multiply-add (precomputed per-channel scale/shift) + ReLU
# ----------------------------------------------------------------------------
def bn_relu_kernel(y_ref, scale_ref, shift_ref, o_ref):
    y = y_ref[...].astype(jnp.float32)                     # (tile_m, cpad)
    o_ref[...] = jnp.maximum(y * scale_ref[...] + shift_ref[...],
                             0.0).astype(o_ref.dtype)


# ----------------------------------------------------------------------------
# Wrapper
# ----------------------------------------------------------------------------
@functools.partial(jax.jit, static_argnames=("n_group", "kernel_size"))
def rot_conv2d_forward(x_nchw, w_oihw, bias_field, gamma_field, beta_field, *,
                       n_group, kernel_size):
    b, cin, h, w = x_nchw.shape
    cout = w_oihw.shape[0]
    nfields = cout // n_group
    k = kernel_size
    pad = (k - 1) // 2
    hw = h * w
    kkc = k * k * cin
    kkc_pad = _round_up(kkc, 128)          # lane-dense contraction dim
    cpad = _round_up(cout, 128)            # lane-dense output-channel dim
    tile_m = _pick_tile(hw, 2048)
    n_tiles = hw // tile_m

    # bf16 BEFORE the layout work (halves transpose/pad/im2col HBM bytes).
    x_bf = x_nchw.astype(jnp.bfloat16)
    x_nhwc = jnp.transpose(x_bf, (0, 2, 3, 1))
    xp = jnp.pad(x_nhwc, ((0, 0), (pad, pad), (pad, pad), (0, 0)))

    # im2col hoisted to the wrapper: each tap is a contiguous slab; fold the
    # kh*kw taps into the contraction dim and zero-pad it to kkc_pad lanes.
    taps = [xp[:, i:i + h, j:j + w, :] for i in range(k) for j in range(k)]
    patches = jnp.concatenate(taps, axis=-1).reshape(b, hw, kkc)
    patches = jnp.pad(patches, ((0, 0), (0, 0), (0, kkc_pad - kkc)))

    # (cout, cin, kh, kw) -> (kh, kw, cin, cout) -> (kkc_pad, cpad), matching
    # the patch column order (i*kw + j)*cin + c.
    w_fold = jnp.transpose(w_oihw, (2, 3, 1, 0)).reshape(kkc, cout)
    w_fold = jnp.pad(w_fold, ((0, kkc_pad - kkc), (0, cpad - cout)))
    w_fold = w_fold.astype(jnp.bfloat16)

    bias_c = jnp.pad(jnp.repeat(bias_field, n_group), (0, cpad - cout))
    bias_c = bias_c.reshape(1, cpad).astype(jnp.float32)

    cparams = pltpu.CompilerParams(
        dimension_semantics=("parallel", "parallel"),
        vmem_limit_bytes=_vmem_limit_bytes())

    # ---- pass 1: conv + bias + per-(batch,tile) partial BN sums -------------
    y_bf16, stats = pl.pallas_call(
        conv_stats_kernel,
        out_shape=(jax.ShapeDtypeStruct((b, hw, cpad), jnp.bfloat16),
                   jax.ShapeDtypeStruct((b, n_tiles, 8, cpad), jnp.float32)),
        grid=(b, n_tiles),
        in_specs=[
            pl.BlockSpec((None, tile_m, kkc_pad), lambda n, t: (n, t, 0)),
            pl.BlockSpec((kkc_pad, cpad), lambda n, t: (0, 0)),
            pl.BlockSpec((1, cpad), lambda n, t: (0, 0)),
        ],
        out_specs=(
            pl.BlockSpec((None, tile_m, cpad), lambda n, t: (n, t, 0)),
            pl.BlockSpec((None, None, 8, cpad), lambda n, t: (n, t, 0, 0)),
        ),
        compiler_params=cparams,
        cost_estimate=pl.CostEstimate(
            flops=2 * b * hw * kkc_pad * cpad,
            transcendentals=0,
            bytes_accessed=(patches.size * 2 + w_fold.size * 2
                            + bias_c.size * 4 + b * hw * cpad * 2
                            + b * n_tiles * 8 * cpad * 4)),
    )(patches, w_fold, bias_c)

    # ---- BN statistics finalize (hoisted out of the per-tile kernel) --------
    st = jnp.sum(stats, axis=(0, 1))                       # (8, cpad) f32
    s1 = st[0, :cout].reshape(nfields, n_group).sum(axis=1)
    s2 = st[1, :cout].reshape(nfields, n_group).sum(axis=1)
    count = float(b * hw * n_group)
    mean_f = s1 / count
    var_f = s2 / count - mean_f * mean_f                   # biased variance
    scale_f = gamma_field.astype(jnp.float32) * jax.lax.rsqrt(var_f + 1e-5)
    shift_f = beta_field.astype(jnp.float32) - mean_f * scale_f
    scale_c = jnp.pad(jnp.repeat(scale_f, n_group),
                      (0, cpad - cout)).reshape(1, cpad)
    shift_c = jnp.pad(jnp.repeat(shift_f, n_group),
                      (0, cpad - cout)).reshape(1, cpad)

    # ---- pass 2: normalize (FMA) + ReLU --------------------------------------
    out_flat = pl.pallas_call(
        bn_relu_kernel,
        out_shape=jax.ShapeDtypeStruct((b, hw, cpad), jnp.float32),
        grid=(b, n_tiles),
        in_specs=[
            pl.BlockSpec((None, tile_m, cpad), lambda n, t: (n, t, 0)),
            pl.BlockSpec((1, cpad), lambda n, t: (0, 0)),
            pl.BlockSpec((1, cpad), lambda n, t: (0, 0)),
        ],
        out_specs=pl.BlockSpec((None, tile_m, cpad), lambda n, t: (n, t, 0)),
        compiler_params=cparams,
        cost_estimate=pl.CostEstimate(
            flops=3 * b * hw * cpad,
            transcendentals=0,
            bytes_accessed=b * hw * cpad * (2 + 4) + 2 * cpad * 4),
    )(y_bf16, scale_c, shift_c)

    out = out_flat.reshape(b, h, w, cpad)[..., :cout]
    # TODO(synk): at production sizes keep the surrounding model NHWC (or fold
    # the channel slice into the pass-2 store) to avoid this extra HBM pass.
    return jnp.transpose(out, (0, 3, 1, 2))


# ----------------------------------------------------------------------------
# Pure-JAX reference (bf16 conv inputs / f32 accumulation, f32 BN epilogue)
# ----------------------------------------------------------------------------
def reference_forward(x_nchw, w_oihw, bias_field, gamma_field, beta_field,
                      n_group, kernel_size):
    pad = (kernel_size - 1) // 2
    y = jax.lax.conv_general_dilated(
        x_nchw.astype(jnp.bfloat16), w_oihw.astype(jnp.bfloat16),
        window_strides=(1, 1), padding=((pad, pad), (pad, pad)),
        dimension_numbers=("NCHW", "OIHW", "NCHW"),
        preferred_element_type=jnp.float32)
    bias_c = jnp.repeat(bias_field, n_group)
    y = y + bias_c[None, :, None, None]
    b, c, h, w = y.shape
    f = c // n_group
    yr = y.reshape(b, f, n_group, h, w)
    mean = yr.mean(axis=(0, 2, 3, 4), keepdims=True)
    var = ((yr - mean) ** 2).mean(axis=(0, 2, 3, 4), keepdims=True)
    yn = (yr - mean) * jax.lax.rsqrt(var + 1e-5)
    yn = (yn * gamma_field[None, :, None, None, None]
          + beta_field[None, :, None, None, None])
    return jnp.maximum(yn, 0.0).reshape(b, c, h, w)


# ----------------------------------------------------------------------------
if __name__ == "__main__":
    # input_channels=4 fields, output_channels=4 fields, N=4 (C_4 group)
    # -> 16 actual conv channels; kernel_size=3, stride=1.
    B, IN_F, OUT_F, N, K, H, W = 2, 4, 4, 4, 3, 16, 16

    key = jax.random.PRNGKey(0)
    k_x, k_psi, k_b, k_g, k_be = jax.random.split(key, 5)

    x = jax.random.normal(k_x, (B, IN_F * N, H, W), jnp.float32)

    psi = 0.1 * jax.random.normal(k_psi, (OUT_F, IN_F, N, K, K), jnp.float32)
    w_oihw = build_c4_regular_weight(psi)              # (OUT_F*N, IN_F*N, K, K)
    bias_f = 0.1 * jax.random.normal(k_b, (OUT_F,), jnp.float32)
    gamma_f = 1.0 + 0.1 * jax.random.normal(k_g, (OUT_F,), jnp.float32)
    beta_f = 0.1 * jax.random.normal(k_be, (OUT_F,), jnp.float32)

    out = rot_conv2d_forward(x, w_oihw, bias_f, gamma_f, beta_f,
                             n_group=N, kernel_size=K)
    out = jax.block_until_ready(out)

    ref = reference_forward(x, w_oihw, bias_f, gamma_f, beta_f, N, K)
    assert out.shape == (B, OUT_F * N, H, W)
    # tolerance loosened slightly vs the f32-intermediate version: y is now
    # round-tripped through bf16 (stats themselves stay f32).
    max_err = float(jnp.max(jnp.abs(out - ref)))
    assert jnp.allclose(out, ref, rtol=1e-2, atol=1e-2), max_err

    print("KERNEL_OK")
</pallas_src>

<mosaic_0001>
module attributes {stable_mosaic.version = 11 : i64} {
  func.func @conv_stats_kernel(%arg0: i32, %arg1: i32, %arg2: memref<1x256x256xbf16, #tpu.memory_space<vmem>>, %arg3: memref<256x128xbf16, #tpu.memory_space<vmem>>, %arg4: memref<1x128xf32, #tpu.memory_space<vmem>>, %arg5: memref<1x256x128xbf16, #tpu.memory_space<vmem>>, %arg6: memref<1x1x8x128xf32, #tpu.memory_space<vmem>>) attributes {dimension_semantics = [#tpu.dimension_semantics<parallel>, #tpu.dimension_semantics<parallel>], iteration_bounds = array<i64: 2, 1>, scalar_prefetch = 0 : i64, scratch_operands = 0 : i64, tpu.core_type = #tpu.core_type<tc>, window_params = [{transform_indices = @transform_0, window_bounds = array<i64: 1, 256, 256>}, {pipeline_mode = #tpu.pipeline_mode<synchronous>, transform_indices = @transform_1, window_bounds = array<i64: 256, 128>}, {pipeline_mode = #tpu.pipeline_mode<synchronous>, transform_indices = @transform_2, window_bounds = array<i64: 1, 128>}, {transform_indices = @transform_3, window_bounds = array<i64: 1, 256, 128>}, {transform_indices = @transform_4, window_bounds = array<i64: 1, 1, 8, 128>}]} {
    %c0 = arith.constant 0 : index
    %c0_0 = arith.constant 0 : index
    %c0_1 = arith.constant 0 : index
    %0 = vector.load %arg2[%c0, %c0_0, %c0_1] : memref<1x256x256xbf16, #tpu.memory_space<vmem>>, vector<1x256x256xbf16>
    %1 = vector.shape_cast %0 : vector<1x256x256xbf16> to vector<256x256xbf16>
    %c0_2 = arith.constant 0 : index
    %c0_3 = arith.constant 0 : index
    %2 = vector.load %arg3[%c0_2, %c0_3] : memref<256x128xbf16, #tpu.memory_space<vmem>>, vector<256x128xbf16>
    %cst = arith.constant dense<0.000000e+00> : vector<256x128xf32>
    %3 = tpu.matmul %1, %2, %cst {dimension_numbers = #tpu.dot_dimension_numbers<[1], [0], [0], [1], [0, 0, 1, 1], [], []>} : vector<256x256xbf16>, vector<256x128xbf16>, vector<256x128xf32> -> vector<256x128xf32>
    %c0_4 = arith.constant 0 : index
    %c0_5 = arith.constant 0 : index
    %4 = vector.load %arg4[%c0_4, %c0_5] : memref<1x128xf32, #tpu.memory_space<vmem>>, vector<1x128xf32>
    %5 = vector.broadcast %4 : vector<1x128xf32> to vector<256x128xf32>
    %6 = arith.addf %3, %5 : vector<256x128xf32>
    %7 = arith.truncf %6 : vector<256x128xf32> to vector<256x128xbf16>
    %c0_6 = arith.constant 0 : index
    %c0_7 = arith.constant 0 : index
    %c0_8 = arith.constant 0 : index
    %8 = vector.load %arg5[%c0_6, %c0_7, %c0_8] : memref<1x256x128xbf16, #tpu.memory_space<vmem>>, vector<1x256x128xbf16>
    %9 = vector.shape_cast %8 : vector<1x256x128xbf16> to vector<256x128xbf16>
    %10 = vector.shape_cast %7 : vector<256x128xbf16> to vector<1x256x128xbf16>
    tpu.vector_store %arg5[%c0_6, %c0_7, %c0_8], %10 {strides = array<i32>} : memref<1x256x128xbf16, #tpu.memory_space<vmem>>, vector<1x256x128xbf16>,
    %cst_9 = arith.constant dense<0.000000e+00> : vector<128xf32>
    %11 = vector.multi_reduction <add>, %6, %cst_9 [0] : vector<256x128xf32> to vector<128xf32>
    %12 = vector.shape_cast %11 : vector<128xf32> to vector<1x128xf32>
    %13 = arith.mulf %6, %6 : vector<256x128xf32>
    %cst_10 = arith.constant dense<0.000000e+00> : vector<128xf32>
    %14 = vector.multi_reduction <add>, %13, %cst_10 [0] : vector<256x128xf32> to vector<128xf32>
    %15 = vector.shape_cast %14 : vector<128xf32> to vector<1x128xf32>
    %cst_11 = arith.constant 0.000000e+00 : f32
    %16 = vector.broadcast %cst_11 : f32 to vector<6x128xf32>
    %17 = tpu.concatenate %12, %15, %16 in 0 : vector<1x128xf32>, vector<1x128xf32>, vector<6x128xf32> -> vector<8x128xf32>
    %c0_12 = arith.constant 0 : index
    %c0_13 = arith.constant 0 : index
    %c0_14 = arith.constant 0 : index
    %c0_15 = arith.constant 0 : index
    %18 = vector.load %arg6[%c0_12, %c0_13, %c0_14, %c0_15] : memref<1x1x8x128xf32, #tpu.memory_space<vmem>>, vector<1x1x8x128xf32>
    %19 = vector.shape_cast %18 : vector<1x1x8x128xf32> to vector<8x128xf32>
    %20 = vector.shape_cast %17 : vector<8x128xf32> to vector<1x1x8x128xf32>
    tpu.vector_store %arg6[%c0_12, %c0_13, %c0_14, %c0_15], %20 {strides = array<i32>} : memref<1x1x8x128xf32, #tpu.memory_space<vmem>>, vector<1x1x8x128xf32>,
    return
  }
  func.func @transform_0(%arg0: i32, %arg1: i32) -> (i32, i32, i32) {
    %c0_i32 = arith.constant 0 : i32
    %c0_i32_0 = arith.constant 0 : i32
    return %arg0, %arg1, %c0_i32 : i32, i32, i32
  }
  func.func @transform_1(%arg0: i32, %arg1: i32) -> (i32, i32) {
    %c0_i32 = arith.constant 0 : i32
    %c0_i32_0 = arith.constant 0 : i32
    %c0_i32_1 = arith.constant 0 : i32
    return %c0_i32, %c0_i32_0 : i32, i32
  }
  func.func @transform_2(%arg0: i32, %arg1: i32) -> (i32, i32) {
    %c0_i32 = arith.constant 0 : i32
    %c0_i32_0 = arith.constant 0 : i32
    %c0_i32_1 = arith.constant 0 : i32
    return %c0_i32, %c0_i32_0 : i32, i32
  }
  func.func @transform_3(%arg0: i32, %arg1: i32) -> (i32, i32, i32) {
    %c0_i32 = arith.constant 0 : i32
    %c0_i32_0 = arith.constant 0 : i32
    return %arg0, %arg1, %c0_i32 : i32, i32, i32
  }
  func.func @transform_4(%arg0: i32, %arg1: i32) -> (i32, i32, i32, i32) {
    %c0_i32 = arith.constant 0 : i32
    %c0_i32_0 = arith.constant 0 : i32
    %c0_i32_1 = arith.constant 0 : i32
    return %arg0, %arg1, %c0_i32, %c0_i32_0 : i32, i32, i32, i32
  }
}

module attributes {stable_mosaic.version = 11 : i64} {
  func.func @bn_relu_kernel(%arg0: i32, %arg1: i32, %arg2: memref<1x256x128xbf16, #tpu.memory_space<vmem>>, %arg3: memref<1x128xf32, #tpu.memory_space<vmem>>, %arg4: memref<1x128xf32, #tpu.memory_space<vmem>>, %arg5: memref<1x256x128xf32, #tpu.memory_space<vmem>>) attributes {dimension_semantics = [#tpu.dimension_semantics<parallel>, #tpu.dimension_semantics<parallel>], iteration_bounds = array<i64: 2, 1>, scalar_prefetch = 0 : i64, scratch_operands = 0 : i64, tpu.core_type = #tpu.core_type<tc>, window_params = [{transform_indices = @transform_0, window_bounds = array<i64: 1, 256, 128>}, {pipeline_mode = #tpu.pipeline_mode<synchronous>, transform_indices = @transform_1, window_bounds = array<i64: 1, 128>}, {pipeline_mode = #tpu.pipeline_mode<synchronous>, transform_indices = @transform_2, window_bounds = array<i64: 1, 128>}, {transform_indices = @transform_3, window_bounds = array<i64: 1, 256, 128>}]} {
    %c0 = arith.constant 0 : index
    %c0_0 = arith.constant 0 : index
    %c0_1 = arith.constant 0 : index
    %0 = vector.load %arg2[%c0, %c0_0, %c0_1] : memref<1x256x128xbf16, #tpu.memory_space<vmem>>, vector<1x256x128xbf16>
    %1 = vector.shape_cast %0 : vector<1x256x128xbf16> to vector<256x128xbf16>
    %2 = arith.extf %1 : vector<256x128xbf16> to vector<256x128xf32>
    %c0_2 = arith.constant 0 : index
    %c0_3 = arith.constant 0 : index
    %3 = vector.load %arg3[%c0_2, %c0_3] : memref<1x128xf32, #tpu.memory_space<vmem>>, vector<1x128xf32>
    %4 = vector.broadcast %3 : vector<1x128xf32> to vector<256x128xf32>
    %5 = arith.mulf %2, %4 : vector<256x128xf32>
    %c0_4 = arith.constant 0 : index
    %c0_5 = arith.constant 0 : index
    %6 = vector.load %arg4[%c0_4, %c0_5] : memref<1x128xf32, #tpu.memory_space<vmem>>, vector<1x128xf32>
    %7 = vector.broadcast %6 : vector<1x128xf32> to vector<256x128xf32>
    %8 = arith.addf %5, %7 : vector<256x128xf32>
    %cst = arith.constant 0.000000e+00 : f32
    %9 = vector.broadcast %cst : f32 to vector<256x128xf32>
    %10 = arith.maximumf %8, %9 : vector<256x128xf32>
    %c0_6 = arith.constant 0 : index
    %c0_7 = arith.constant 0 : index
    %c0_8 = arith.constant 0 : index
    %11 = vector.load %arg5[%c0_6, %c0_7, %c0_8] : memref<1x256x128xf32, #tpu.memory_space<vmem>>, vector<1x256x128xf32>
    %12 = vector.shape_cast %11 : vector<1x256x128xf32> to vector<256x128xf32>
    %13 = vector.shape_cast %10 : vector<256x128xf32> to vector<1x256x128xf32>
    tpu.vector_store %arg5[%c0_6, %c0_7, %c0_8], %13 {strides = array<i32>} : memref<1x256x128xf32, #tpu.memory_space<vmem>>, vector<1x256x128xf32>,
    return
  }
  func.func @transform_0(%arg0: i32, %arg1: i32) -> (i32, i32, i32) {
    %c0_i32 = arith.constant 0 : i32
    %c0_i32_0 = arith.constant 0 : i32
    return %arg0, %arg1, %c0_i32 : i32, i32, i32
  }
  func.func @transform_1(%arg0: i32, %arg1: i32) -> (i32, i32) {
    %c0_i32 = arith.constant 0 : i32
    %c0_i32_0 = arith.constant 0 : i32
    %c0_i32_1 = arith.constant 0 : i32
    return %c0_i32, %c0_i32_0 : i32, i32
  }
  func.func @transform_2(%arg0: i32, %arg1: i32) -> (i32, i32) {
    %c0_i32 = arith.constant 0 : i32
    %c0_i32_0 = arith.constant 0 : i32
    %c0_i32_1 = arith.constant 0 : i32
    return %c0_i32, %c0_i32_0 : i32, i32
  }
  func.func @transform_3(%arg0: i32, %arg1: i32) -> (i32, i32, i32) {
    %c0_i32 = arith.constant 0 : i32
    %c0_i32_0 = arith.constant 0 : i32
    return %arg0, %arg1, %c0_i32 : i32, i32, i32
  }
}

</mosaic_0001>

<bundles_post_ra>
// kernel: squeeze.2
= control target key start
LH: loop header
LB: loop body
LE: loop exit
PB: predicated region body
PF: predicated region fallthrough
CT: control target
= control target key end

     0   :  { %s37_s8 = smov 116   ;;  %s38_s9 = smov 120   ;;  %vm7_vm0 = vcmask 31744   ;;  %s55_s0 = inlined_call_operand.vmem [shape: f32[16], index: 0, kind: input, shape index: {}]   ;;  %s56_s1 = inlined_call_operand.vmem [shape: f32[4,4], index: 1, kind: output, shape index: {}]  }
   0x1   :  { %v4_v0 = vld [vmem:[%s55_s0] sm:$0x1]  ;;  %s36_s0 = smov 124  }
   0x2   :  { %5 = vst [vmem:[#allocation1] sm:$0x1] %v4_v0 }
   0x9   :  { %v9_v1 = vld [vmem:[#allocation1] sm:$0x1]  }
   0xa   :  { %v21_v2 = vld [vmem:[#allocation1] sm:$0x1]   ;;  %10 = vrot.lane.b32.xlu0 %v9_v1, %s36_s0 }
   0xb   :  { %22 = vrot.lane.b32.xlu1 %v21_v2, %s37_s8  ;;  %v15_v3 = vld [vmem:[#allocation1] sm:$0x1]  }
   0xc   :  { %v6_v4 = vld [vmem:[#allocation1] sm:$0x1]  }
   0xd   :  { %8 = vst.msk [vmem:[#allocation0] sm:$0x1] %vm7_vm0, %v6_v4  }
  0x12   :  { %16 = vrot.lane.b32.xlu0 %v15_v3, %s38_s9 }
  0x7c   :  { %v11_v5 = vpop.permute.xlu0 %10  }
  0x7d   :  { %v23_v6 = vpop.permute.xlu1 %22   ;;  %14 = vst.msk [vmem:[#allocation0 + $0x1] sm:$0x1] %vm7_vm0, %v11_v5  }
  0x7e   :  { %26 = vst.msk [vmem:[#allocation0 + $0x3] sm:$0x1] %vm7_vm0, %v23_v6  }
  0x84   :  { %v17_v7 = vpop.permute.xlu0 %16  }
  0x85   :  { %20 = vst.msk [vmem:[#allocation0 + $0x2] sm:$0x1] %vm7_vm0, %v17_v7  }
  0x8c   :  { %v29_v8 = vld [vmem:[#allocation0] sm:$0xf] }
  0x8d   :  { %32 = vst [vmem:[%s56_s1] sm:$0xf] %v29_v8 }

// kernel: rot_conv2d_forward.3
= control target key start
LH: loop header
LB: loop body
LE: loop exit
PB: predicated region body
PF: predicated region fallthrough
CT: control target
= control target key end

     0   :  { %s659_s12 = smov 0   ;;  %s661_s13 = smov 0   ;;  %s822_s0 = inlined_call_operand.vmem [shape: bf16[2,256,128], index: 0, kind: input, shape index: {}]   ;;  %s823_s1 = inlined_call_operand.vmem [shape: f32[1,128], index: 1, kind: input, shape index: {}]   ;;  %s824_s2 = inlined_call_operand.vmem [shape: f32[1,128], index: 2, kind: input, shape index: {}]   ;;  %s825_s3 = inlined_call_operand.vmem [shape: f32[2,256,128], index: 3, kind: output, shape index: {}]  }
   0x1   :  { %s663_s14 = smov 0  }
   0x2 LB: > { %s25_s15 = sadd.s32 1, %s633_s13  ;;  %p501_p0 = scmp.ge.s32.totalorder %s637_s14, 1  ;;  %s637_s14 = sphi %s663_s14, %s13_s14   ;;  %s633_s13 = sphi %s661_s13, %s827_s13   ;;  %s629_s12 = sphi %s659_s12, %s826_s12  }
   0x3   : > { %p27_p1 = scmp.ge.s32.totalorder %s25_s15, 2  ;;  %p158_p2 = scmp.lt.s32.totalorder %s637_s14, 3 }
   0x5   : > { %s829_s15 = smov (%p27_p1, %s25_s15), 0  ;;  %p159_p3 = pnand %p501_p0, %p158_p2 }
   0x6   : > { %p191_p4 = scmp.lt.s32.totalorder (!%p159_p3), %s629_s12, 1 }
   0x7   : > { %162 = sbr.rel (%p159_p3) target bundleno = 56 (0x38), region = 32 }
   0xc   : > { %s831_s12 = smov (!%p191_p4, %s629_s12), 1  ;;  %v688_v0 = vld [vmem:[%s823_s1] ss:$0 sm:$0xff] }
   0xd   : > { %s508_s16 = sshll.u32 %s831_s12, 7  ;;  %v696_v5 = vld [vmem:[%s824_s2] ss:$0 sm:$0xff]  ;;  %s509_s24 = sshll.u32 %s831_s12, 8 }
   0xe   : > { %s683_s19 = scalar_lea.vmem %s822_s0, %s508_s16  ;;  %s715_s27 = scalar_lea.vmem %s825_s3, %s509_s24 }
   0xf   : > { %v511_v1 = vld [vmem:[%s683_s19] sm:$0xff]   ;;  %v574_v2 = vld [vmem:[%s683_s19 + $0x8] sm:$0xff]   ;;  %v575_v3 = vld [vmem:[%s683_s19 + $0x10] sm:$0xff]  }
  0x10   : > { %v512_v4 = vunpack.c.l.bf16 %v511_v1  ;;  %v513_v6 = vunpack.c.h.bf16 %v511_v1  ;;  %v516_v7 = vunpack.c.l.bf16 %v574_v2  ;;  %v517_v8 = vunpack.c.h.bf16 %v574_v2  ;;  %v576_v9 = vld [vmem:[%s683_s19 + $0x18] sm:$0xff]   ;;  %v577_v30 = vld [vmem:[%s683_s19 + $0x20] sm:$0xff]   ;;  %v578_v31 = vld [vmem:[%s683_s19 + $0x28] sm:$0xff]  }
  0x11   : > { %v520_v10 = vunpack.c.l.bf16 %v575_v3  ;;  %v521_v11 = vunpack.c.h.bf16 %v575_v3  ;;  %v524_v12 = vunpack.c.l.bf16 %v576_v9  ;;  %v525_v13 = vunpack.c.h.bf16 %v576_v9  ;;  %v579_v36 = vld [vmem:[%s683_s19 + $0x30] sm:$0xff]   ;;  %v580_v37 = vld [vmem:[%s683_s19 + $0x38] sm:$0xff]   ;;  %v581_v3 = vld [vmem:[%s683_s19 + $0x40] sm:$0xff]  }
  0x12   : > { %v278_v14 = vmul.f32 %v688_v0, %v512_v4  ;;  %v279_v15 = vmul.f32 %v688_v0, %v513_v6  ;;  %v280_v16 = vmul.f32 %v688_v0, %v516_v7  ;;  %v281_v17 = vmul.f32 %v688_v0, %v517_v8  ;;  %v582_v4 = vld [vmem:[%s683_s19 + $0x48] sm:$0xff]   ;;  %v583_v6 = vld [vmem:[%s683_s19 + $0x50] sm:$0xff]  }
  0x13   : > { %v282_v18 = vmul.f32 %v688_v0, %v520_v10  ;;  %v283_v19 = vmul.f32 %v688_v0, %v521_v11  ;;  %v284_v20 = vmul.f32 %v688_v0, %v524_v12  ;;  %v285_v21 = vmul.f32 %v688_v0, %v525_v13  ;;  %v584_v11 = vld [vmem:[%s683_s19 + $0x58] sm:$0xff]  }
  0x14   : > { %v314_v22 = vadd.f32 %v696_v5, %v278_v14  ;;  %v315_v23 = vadd.f32 %v696_v5, %v279_v15  ;;  %v316_v24 = vadd.f32 %v696_v5, %v280_v16  ;;  %v317_v25 = vadd.f32 %v696_v5, %v281_v17 }
  0x15   : > { %v318_v26 = vadd.f32 %v696_v5, %v282_v18  ;;  %v319_v27 = vadd.f32 %v696_v5, %v283_v19  ;;  %v320_v28 = vadd.f32 %v696_v5, %v284_v20  ;;  %v321_v29 = vadd.f32 %v696_v5, %v285_v21 }
  0x16   : > { %v346_v32 = vmax.f32 %v314_v22, 0.0  ;;  %v347_v33 = vmax.f32 %v315_v23, 0.0  ;;  %v348_v34 = vmax.f32 %v316_v24, 0.0  ;;  %v349_v35 = vmax.f32 %v317_v25, 0.0 }
  0x17   : > { %v350_v38 = vmax.f32 %v318_v26, 0.0  ;;  %v351_v39 = vmax.f32 %v319_v27, 0.0  ;;  %v352_v40 = vmax.f32 %v320_v28, 0.0  ;;  %v353_v41 = vmax.f32 %v321_v29, 0.0 }
  0x18   : > { %378 = vst [vmem:[%s715_s27] sm:$0xff] %v346_v32  ;;  %v528_v42 = vunpack.c.l.bf16 %v577_v30  ;;  %v529_v43 = vunpack.c.h.bf16 %v577_v30  ;;  %v532_v44 = vunpack.c.l.bf16 %v578_v31  ;;  %v533_v45 = vunpack.c.h.bf16 %v578_v31 }
  0x19   : > { %379 = vst [vmem:[%s715_s27 + $0x8] sm:$0xff] %v347_v33  ;;  %v536_v46 = vunpack.c.l.bf16 %v579_v36  ;;  %v537_v47 = vunpack.c.h.bf16 %v579_v36  ;;  %v540_v48 = vunpack.c.l.bf16 %v580_v37  ;;  %v541_v49 = vunpack.c.h.bf16 %v580_v37 }
  0x1a   : > { %380 = vst [vmem:[%s715_s27 + $0x10] sm:$0xff] %v348_v34  ;;  %v286_v50 = vmul.f32 %v688_v0, %v528_v42  ;;  %v287_v51 = vmul.f32 %v688_v0, %v529_v43  ;;  %v288_v52 = vmul.f32 %v688_v0, %v532_v44  ;;  %v289_v53 = vmul.f32 %v688_v0, %v533_v45  ;;  %v587_v42 = vld [vmem:[%s683_s19 + $0x70] sm:$0xff]  }
  0x1b   : > { %381 = vst [vmem:[%s715_s27 + $0x18] sm:$0xff] %v349_v35  ;;  %v290_v54 = vmul.f32 %v688_v0, %v536_v46  ;;  %v291_v55 = vmul.f32 %v688_v0, %v537_v47  ;;  %v292_v56 = vmul.f32 %v688_v0, %v540_v48  ;;  %v293_v57 = vmul.f32 %v688_v0, %v541_v49  ;;  %v588_v47 = vld [vmem:[%s683_s19 + $0x78] sm:$0xff]  }
  0x1c   : > { %382 = vst [vmem:[%s715_s27 + $0x20] sm:$0xff] %v350_v38  ;;  %v322_v58 = vadd.f32 %v696_v5, %v286_v50  ;;  %v323_v59 = vadd.f32 %v696_v5, %v287_v51  ;;  %v324_v60 = vadd.f32 %v696_v5, %v288_v52  ;;  %v325_v61 = vadd.f32 %v696_v5, %v289_v53 }
  0x1d   : > { %383 = vst [vmem:[%s715_s27 + $0x28] sm:$0xff] %v351_v39  ;;  %v326_v62 = vadd.f32 %v696_v5, %v290_v54  ;;  %v327_v63 = vadd.f32 %v696_v5, %v291_v55  ;;  %v328_v1 = vadd.f32 %v696_v5, %v292_v56  ;;  %v329_v2 = vadd.f32 %v696_v5, %v293_v57 }
  0x1e   : > { %384 = vst [vmem:[%s715_s27 + $0x30] sm:$0xff] %v352_v40  ;;  %v354_v7 = vmax.f32 %v322_v58, 0.0  ;;  %v355_v8 = vmax.f32 %v323_v59, 0.0  ;;  %v356_v9 = vmax.f32 %v324_v60, 0.0  ;;  %v357_v10 = vmax.f32 %v325_v61, 0.0  ;;  %v585_v40 = vld [vmem:[%s683_s19 + $0x60] sm:$0xff]  }
  0x1f   : > { %385 = vst [vmem:[%s715_s27 + $0x38] sm:$0xff] %v353_v41  ;;  %v358_v12 = vmax.f32 %v326_v62, 0.0  ;;  %v359_v13 = vmax.f32 %v327_v63, 0.0  ;;  %v360_v14 = vmax.f32 %v328_v1, 0.0  ;;  %v361_v15 = vmax.f32 %v329_v2, 0.0  ;;  %v586_v41 = vld [vmem:[%s683_s19 + $0x68] sm:$0xff]  }
  0x20   : > { %386 = vst [vmem:[%s715_s27 + $0x40] sm:$0xff] %v354_v7  ;;  %v544_v16 = vunpack.c.l.bf16 %v581_v3  ;;  %v545_v17 = vunpack.c.h.bf16 %v581_v3  ;;  %v548_v18 = vunpack.c.l.bf16 %v582_v4  ;;  %v549_v19 = vunpack.c.h.bf16 %v582_v4 }
  0x21   : > { %387 = vst [vmem:[%s715_s27 + $0x48] sm:$0xff] %v355_v8  ;;  %v552_v20 = vunpack.c.l.bf16 %v583_v6  ;;  %v553_v21 = vunpack.c.h.bf16 %v583_v6  ;;  %v556_v22 = vunpack.c.l.bf16 %v584_v11  ;;  %v557_v23 = vunpack.c.h.bf16 %v584_v11 }
  0x22   : > { %388 = vst [vmem:[%s715_s27 + $0x50] sm:$0xff] %v356_v9  ;;  %v294_v24 = vmul.f32 %v688_v0, %v544_v16  ;;  %v295_v25 = vmul.f32 %v688_v0, %v545_v17  ;;  %v296_v26 = vmul.f32 %v688_v0, %v548_v18  ;;  %v297_v27 = vmul.f32 %v688_v0, %v549_v19 }
  0x23   : > { %389 = vst [vmem:[%s715_s27 + $0x58] sm:$0xff] %v357_v10  ;;  %v298_v28 = vmul.f32 %v688_v0, %v552_v20  ;;  %v299_v29 = vmul.f32 %v688_v0, %v553_v21  ;;  %v300_v30 = vmul.f32 %v688_v0, %v556_v22  ;;  %v301_v31 = vmul.f32 %v688_v0, %v557_v23 }
  0x24   : > { %390 = vst [vmem:[%s715_s27 + $0x60] sm:$0xff] %v358_v12  ;;  %v330_v32 = vadd.f32 %v696_v5, %v294_v24  ;;  %v331_v33 = vadd.f32 %v696_v5, %v295_v25  ;;  %v332_v34 = vadd.f32 %v696_v5, %v296_v26  ;;  %v333_v35 = vadd.f32 %v696_v5, %v297_v27 }
  0x25   : > { %391 = vst [vmem:[%s715_s27 + $0x68] sm:$0xff] %v359_v13  ;;  %v334_v36 = vadd.f32 %v696_v5, %v298_v28  ;;  %v335_v37 = vadd.f32 %v696_v5, %v299_v29  ;;  %v336_v38 = vadd.f32 %v696_v5, %v300_v30  ;;  %v337_v39 = vadd.f32 %v696_v5, %v301_v31 }
  0x26   : > { %392 = vst [vmem:[%s715_s27 + $0x70] sm:$0xff] %v360_v14  ;;  %v362_v43 = vmax.f32 %v330_v32, 0.0  ;;  %v363_v44 = vmax.f32 %v331_v33, 0.0  ;;  %v364_v45 = vmax.f32 %v332_v34, 0.0  ;;  %v365_v46 = vmax.f32 %v333_v35, 0.0 }
  0x27   : > { %393 = vst [vmem:[%s715_s27 + $0x78] sm:$0xff] %v361_v15  ;;  %v366_v48 = vmax.f32 %v334_v36, 0.0  ;;  %v367_v49 = vmax.f32 %v335_v37, 0.0  ;;  %v368_v50 = vmax.f32 %v336_v38, 0.0  ;;  %v369_v51 = vmax.f32 %v337_v39, 0.0 }
  0x28   : > { %394 = vst [vmem:[%s715_s27 + $0x80] sm:$0xff] %v362_v43  ;;  %v560_v52 = vunpack.c.l.bf16 %v585_v40  ;;  %v561_v53 = vunpack.c.h.bf16 %v585_v40  ;;  %v564_v54 = vunpack.c.l.bf16 %v586_v41  ;;  %v565_v55 = vunpack.c.h.bf16 %v586_v41 }
  0x29   : > { %395 = vst [vmem:[%s715_s27 + $0x88] sm:$0xff] %v363_v44  ;;  %v568_v56 = vunpack.c.l.bf16 %v587_v42  ;;  %v569_v57 = vunpack.c.h.bf16 %v587_v42  ;;  %v572_v58 = vunpack.c.l.bf16 %v588_v47  ;;  %v573_v59 = vunpack.c.h.bf16 %v588_v47 }
  0x2a   : > { %396 = vst [vmem:[%s715_s27 + $0x90] sm:$0xff] %v364_v45  ;;  %v302_v60 = vmul.f32 %v688_v0, %v560_v52  ;;  %v303_v61 = vmul.f32 %v688_v0, %v561_v53  ;;  %v304_v62 = vmul.f32 %v688_v0, %v564_v54  ;;  %v305_v63 = vmul.f32 %v688_v0, %v565_v55 }
  0x2b   : > { %397 = vst [vmem:[%s715_s27 + $0x98] sm:$0xff] %v365_v46  ;;  %v306_v1 = vmul.f32 %v688_v0, %v568_v56  ;;  %v307_v2 = vmul.f32 %v688_v0, %v569_v57  ;;  %v308_v3 = vmul.f32 %v688_v0, %v572_v58  ;;  %v309_v4 = vmul.f32 %v688_v0, %v573_v59 }
  0x2c   : > { %398 = vst [vmem:[%s715_s27 + $0xa0] sm:$0xff] %v366_v48  ;;  %v338_v6 = vadd.f32 %v696_v5, %v302_v60  ;;  %v339_v7 = vadd.f32 %v696_v5, %v303_v61  ;;  %v340_v8 = vadd.f32 %v696_v5, %v304_v62  ;;  %v341_v9 = vadd.f32 %v696_v5, %v305_v63 }
  0x2d   : > { %399 = vst [vmem:[%s715_s27 + $0xa8] sm:$0xff] %v367_v49  ;;  %v342_v10 = vadd.f32 %v696_v5, %v306_v1  ;;  %v343_v11 = vadd.f32 %v696_v5, %v307_v2  ;;  %v344_v14 = vadd.f32 %v696_v5, %v308_v3  ;;  %v345_v16 = vadd.f32 %v696_v5, %v309_v4 }
  0x2e   : > { %400 = vst [vmem:[%s715_s27 + $0xb0] sm:$0xff] %v368_v50  ;;  %v370_v0 = vmax.f32 %v338_v6, 0.0  ;;  %v371_v12 = vmax.f32 %v339_v7, 0.0  ;;  %v372_v13 = vmax.f32 %v340_v8, 0.0  ;;  %v373_v15 = vmax.f32 %v341_v9, 0.0 }
  0x2f   : > { %401 = vst [vmem:[%s715_s27 + $0xb8] sm:$0xff] %v369_v51  ;;  %v374_v17 = vmax.f32 %v342_v10, 0.0  ;;  %v375_v18 = vmax.f32 %v343_v11, 0.0  ;;  %v376_v19 = vmax.f32 %v344_v14, 0.0  ;;  %v377_v20 = vmax.f32 %v345_v16, 0.0 }
  0x30   : > { %402 = vst [vmem:[%s715_s27 + $0xc0] sm:$0xff] %v370_v0 }
  0x31   : > { %403 = vst [vmem:[%s715_s27 + $0xc8] sm:$0xff] %v371_v12 }
  0x32   : > { %404 = vst [vmem:[%s715_s27 + $0xd0] sm:$0xff] %v372_v13 }
  0x33   : > { %405 = vst [vmem:[%s715_s27 + $0xd8] sm:$0xff] %v373_v15 }
  0x34   : > { %406 = vst [vmem:[%s715_s27 + $0xe0] sm:$0xff] %v374_v17 }
  0x35   : > { %407 = vst [vmem:[%s715_s27 + $0xe8] sm:$0xff] %v375_v18 }
  0x36   : > { %408 = vst [vmem:[%s715_s27 + $0xf0] sm:$0xff] %v376_v19 }
  0x37   : > { %409 = vst [vmem:[%s715_s27 + $0xf8] sm:$0xff] %v377_v20 }
  0x38 PF: > { %s13_s14 = sadd.s32 1, %s637_s14   ;;  %s826_s12 = smov %s633_s13 }
  0x39   : > { %p10_p5 = scmp.ge.s32.totalorder %s13_s14, 4   ;;  %s827_s13 = smov %s829_s15 }
  0x3b   :  { %12 = sbr.rel (!%p10_p5) target bundleno = 2 (0x2), region = 62 }

// kernel: rot_conv2d_forward.2
= control target key start
LH: loop header
LB: loop body
LE: loop exit
PB: predicated region body
PF: predicated region fallthrough
CT: control target
= control target key end

     0   :  { %s1506_s15 = smov 0   ;;  %s1508_s16 = smov 0   ;;  %s1840_s0 = inlined_call_operand.vmem [shape: bf16[2,256,256], index: 0, kind: input, shape index: {}]   ;;  %s1841_s1 = inlined_call_operand.vmem [shape: bf16[256,128], index: 1, kind: input, shape index: {}]   ;;  %s1842_s2 = inlined_call_operand.vmem [shape: f32[1,128], index: 2, kind: input, shape index: {}]   ;;  %s1843_s3 = inlined_call_operand.vmem [shape: bf16[2,256,128], index: 3, kind: output, shape index: {0}]   ;;  %s1844_s4 = inlined_call_operand.vmem [shape: f32[2,1,8,128], index: 4, kind: output, shape index: {1}]  }
   0x1   :  { %s1510_s17 = smov 0  }
   0x2 LB: > { %s27_s18 = sadd.s32 1, %s1475_s16  ;;  %p1071_p0 = scmp.ge.s32.totalorder %s1479_s17, 1  ;;  %s1479_s17 = sphi %s1510_s17, %s15_s17   ;;  %s1475_s16 = sphi %s1508_s16, %s1846_s16   ;;  %s1471_s15 = sphi %s1506_s15, %s1845_s15  }
   0x3   : > { %p29_p1 = scmp.ge.s32.totalorder %s27_s18, 2  ;;  %p189_p2 = scmp.lt.s32.totalorder %s1479_s17, 3 }
   0x5   : > { %s1848_s18 = smov (%p29_p1, %s27_s18), 0  ;;  %p190_p3 = pnand %p1071_p0, %p189_p2 }
   0x6   : > { %p232_p4 = scmp.lt.s32.totalorder (!%p190_p3), %s1471_s15, 1 }
   0x7   : > { %193 = sbr.rel (%p190_p3) target bundleno = 345 (0x159), region = 32 }
   0xc   : > { %v1312_v0 = vld [vmem:[%s1841_s1 + $0x38] sm:$0xff]  ;;  %v1311_v2 = vld [vmem:[%s1841_s1 + $0x30] sm:$0xff]  ;;  %v1310_v4 = vld [vmem:[%s1841_s1 + $0x28] sm:$0xff]  ;;  %s1850_s15 = smov (!%p232_p4, %s1471_s15), 1  ;;  %vm931_vm0 = vcmask 1040384   ;;  %vm933_vm1 = vcmask 1041408  }
   0xd   : > { %v1320_v1 = vld [vmem:[%s1841_s1 + $0x78] sm:$0xff]  ;;  %583 = vmatpush.bf16.msra.mxu0 %v1312_v0  ;;  %v1319_v3 = vld [vmem:[%s1841_s1 + $0x70] sm:$0xff]  ;;  %1416 = vmatpush.bf16.msra.mxu2 %v1312_v0  ;;  %v1318_v5 = vld [vmem:[%s1841_s1 + $0x68] sm:$0xff]  ;;  %s1271_s21 = sshll.u32 %s1850_s15, 8  ;;  %s1272_s9 = sshll.u32 %s1850_s15, 7 }
   0xe   : > { %672 = vmatpush.bf16.msra.mxu1 %v1320_v1  ;;  %1424 = vmatpush.bf16.msra.mxu3 %v1320_v1  ;;  %v1309_v6 = vld [vmem:[%s1841_s1 + $0x20] sm:$0xff]  ;;  %v1308_v8 = vld [vmem:[%s1841_s1 + $0x18] sm:$0xff]  ;;  %v1307_v10 = vld [vmem:[%s1841_s1 + $0x10] sm:$0xff]  ;;  %s1576_s28 = scalar_lea.vmem %s1840_s0, %s1271_s21  ;;  %s1659_s12 = scalar_lea.vmem %s1843_s3, %s1272_s9 }
   0xf   : > { %v1317_v7 = vld [vmem:[%s1841_s1 + $0x60] sm:$0xff]  ;;  %v1316_v9 = vld [vmem:[%s1841_s1 + $0x58] sm:$0xff]  ;;  %v1315_v11 = vld [vmem:[%s1841_s1 + $0x50] sm:$0xff]  ;;  %s1076_s13 = sshll.u32 %s1850_s15, 3 }
  0x10   : > { %v1306_v12 = vld [vmem:[%s1841_s1 + $0x8] sm:$0xff]  ;;  %v1305_v14 = vld [vmem:[%s1841_s1] sm:$0xff]  ;;  %v1087_v28 = vld [vmem:[%s1576_s28 + $0x10] sm:$0xf]  ;;  %s258_s20 = scalar_lea.vmem %s1844_s4, %s1076_s13 }
  0x11   : > { %584 = vmatpush.bf16.msra.mxu0 %v1311_v2  ;;  %1417 = vmatpush.bf16.msra.mxu2 %v1311_v2  ;;  %v1314_v13 = vld [vmem:[%s1841_s1 + $0x48] sm:$0xff]  ;;  %v1313_v15 = vld [vmem:[%s1841_s1 + $0x40] sm:$0xff]  ;;  %v1276_v29 = vld [vmem:[%s1576_s28 + $0x14] sm:$0xf0] }
  0x12   : > { %673 = vmatpush.bf16.msra.mxu1 %v1319_v3  ;;  %1425 = vmatpush.bf16.msra.mxu3 %v1319_v3  ;;  %v1079_v16 = vld [vmem:[%s1576_s28] sm:$0xf]  ;;  %v1274_v17 = vld [vmem:[%s1576_s28 + $0x4] sm:$0xf0]  ;;  %v1273_v18 = vld [vmem:[%s1576_s28 + $0x4] sm:$0xf]  ;;  %v1088_v36 = vor.u32 %v1276_v29, %v1087_v28 }
  0x13   : > { %v1081_v19 = vld [vmem:[%s1576_s28 + $0x8] sm:$0xf0]  ;;  %v1143_v20 = vld [vmem:[%s1576_s28 + $0x80] sm:$0xf]  ;;  %v1290_v21 = vld [vmem:[%s1576_s28 + $0x84] sm:$0xf0]  ;;  %v1080_v24 = vor.u32 %v1274_v17, %v1079_v16 }
  0x14   : > { %v1289_v22 = vld [vmem:[%s1576_s28 + $0x84] sm:$0xf]  ;;  %v1145_v23 = vld [vmem:[%s1576_s28 + $0x88] sm:$0xf0]  ;;  %v1084_v25 = vor.u32 %v1273_v18, %v1081_v19  ;;  %v1144_v26 = vor.u32 %v1290_v21, %v1143_v20  ;;  %v1275_v30 = vld [vmem:[%s1576_s28 + $0x14] sm:$0xf] }
  0x15   : > { %585 = vmatpush.bf16.msra.mxu0 %v1310_v4  ;;  %1418 = vmatpush.bf16.msra.mxu2 %v1310_v4  ;;  %v1148_v27 = vor.u32 %v1289_v22, %v1145_v23  ;;  %v1089_v31 = vld [vmem:[%s1576_s28 + $0x18] sm:$0xf0]  ;;  %v1151_v32 = vld [vmem:[%s1576_s28 + $0x90] sm:$0xf]  ;;  %v1292_v33 = vld [vmem:[%s1576_s28 + $0x94] sm:$0xf0] }
  0x16   : > { %674 = vmatpush.bf16.msra.mxu1 %v1318_v5  ;;  %1426 = vmatpush.bf16.msra.mxu3 %v1318_v5  ;;  %v1291_v34 = vld [vmem:[%s1576_s28 + $0x94] sm:$0xf]  ;;  %v1153_v35 = vld [vmem:[%s1576_s28 + $0x98] sm:$0xf0]  ;;  %v1092_v37 = vor.u32 %v1275_v30, %v1089_v31  ;;  %v1152_v38 = vor.u32 %v1292_v33, %v1151_v32  ;;  %v1095_v40 = vld [vmem:[%s1576_s28 + $0x20] sm:$0xf] }
  0x17   : > { %v1156_v39 = vor.u32 %v1291_v34, %v1153_v35  ;;  %v1278_v41 = vld [vmem:[%s1576_s28 + $0x24] sm:$0xf0]  ;;  %v1277_v42 = vld [vmem:[%s1576_s28 + $0x24] sm:$0xf]  ;;  %v1097_v43 = vld [vmem:[%s1576_s28 + $0x28] sm:$0xf0] }
  0x18   : > { %v1159_v44 = vld [vmem:[%s1576_s28 + $0xa0] sm:$0xf]  ;;  %v1294_v45 = vld [vmem:[%s1576_s28 + $0xa4] sm:$0xf0]  ;;  %v1293_v46 = vld [vmem:[%s1576_s28 + $0xa4] sm:$0xf]  ;;  %v1096_v48 = vor.u32 %v1278_v41, %v1095_v40  ;;  %v1100_v49 = vor.u32 %v1277_v42, %v1097_v43 }
  0x19   : > { %586 = vmatpush.bf16.msra.mxu0 %v1309_v6  ;;  %1419 = vmatpush.bf16.msra.mxu2 %v1309_v6  ;;  %v1161_v47 = vld [vmem:[%s1576_s28 + $0xa8] sm:$0xf0]  ;;  %v1160_v50 = vor.u32 %v1294_v45, %v1159_v44  ;;  %v1103_v52 = vld [vmem:[%s1576_s28 + $0x30] sm:$0xf]  ;;  %v1280_v53 = vld [vmem:[%s1576_s28 + $0x34] sm:$0xf0] }
  0x1a   : > { %675 = vmatpush.bf16.msra.mxu1 %v1317_v7  ;;  %1427 = vmatpush.bf16.msra.mxu3 %v1317_v7  ;;  %v1164_v51 = vor.u32 %v1293_v46, %v1161_v47  ;;  %v1279_v54 = vld [vmem:[%s1576_s28 + $0x34] sm:$0xf]  ;;  %v1105_v55 = vld [vmem:[%s1576_s28 + $0x38] sm:$0xf0]  ;;  %v1167_v56 = vld [vmem:[%s1576_s28 + $0xb0] sm:$0xf]  ;;  %v1104_v60 = vor.u32 %v1280_v53, %v1103_v52 }
  0x1b   : > { %v1296_v57 = vld [vmem:[%s1576_s28 + $0xb4] sm:$0xf0]  ;;  %v1295_v58 = vld [vmem:[%s1576_s28 + $0xb4] sm:$0xf]  ;;  %v1169_v59 = vld [vmem:[%s1576_s28 + $0xb8] sm:$0xf0]  ;;  %v1108_v61 = vor.u32 %v1279_v54, %v1105_v55 }
  0x1c   : > { %v1168_v62 = vor.u32 %v1296_v57, %v1167_v56  ;;  %v1172_v63 = vor.u32 %v1295_v58, %v1169_v59  ;;  %v1111_v0 = vld [vmem:[%s1576_s28 + $0x40] sm:$0xf]  ;;  %v1282_v1 = vld [vmem:[%s1576_s28 + $0x44] sm:$0xf0]  ;;  %v1281_v2 = vld [vmem:[%s1576_s28 + $0x44] sm:$0xf] }
  0x1d   : > { %587 = vmatpush.bf16.msra.mxu0 %v1308_v8  ;;  %1420 = vmatpush.bf16.msra.mxu2 %v1308_v8  ;;  %v1113_v3 = vld [vmem:[%s1576_s28 + $0x48] sm:$0xf0]  ;;  %v1175_v4 = vld [vmem:[%s1576_s28 + $0xc0] sm:$0xf]  ;;  %v1298_v5 = vld [vmem:[%s1576_s28 + $0xc4] sm:$0xf0]  ;;  %v1112_v8 = vor.u32 %v1282_v1, %v1111_v0 }
  0x1e   : > { %676 = vmatpush.bf16.msra.mxu1 %v1316_v9  ;;  %1428 = vmatpush.bf16.msra.mxu3 %v1316_v9  ;;  %v1297_v6 = vld [vmem:[%s1576_s28 + $0xc4] sm:$0xf]  ;;  %v1177_v7 = vld [vmem:[%s1576_s28 + $0xc8] sm:$0xf0]  ;;  %v1116_v9 = vor.u32 %v1281_v2, %v1113_v3  ;;  %v1183_v16 = vld [vmem:[%s1576_s28 + $0xd0] sm:$0xf] }
  0x1f   : > { %v1300_v17 = vld [vmem:[%s1576_s28 + $0xd4] sm:$0xf0]  ;;  %v1299_v18 = vld [vmem:[%s1576_s28 + $0xd4] sm:$0xf]  ;;  %v1185_v19 = vld [vmem:[%s1576_s28 + $0xd8] sm:$0xf0] }
  0x20   : > { %v1184_v22 = vor.u32 %v1300_v17, %v1183_v16  ;;  %v1188_v23 = vor.u32 %v1299_v18, %v1185_v19  ;;  %v1191_v28 = vld [vmem:[%s1576_s28 + $0xe0] sm:$0xf]  ;;  %v1302_v29 = vld [vmem:[%s1576_s28 + $0xe4] sm:$0xf0]  ;;  %v1301_v30 = vld [vmem:[%s1576_s28 + $0xe4] sm:$0xf] }
  0x21   : > { %588 = vmatpush.bf16.msra.mxu0 %v1307_v10  ;;  %1421 = vmatpush.bf16.msra.mxu2 %v1307_v10  ;;  %v1176_v10 = vor.u32 %v1298_v5, %v1175_v4  ;;  %v1193_v31 = vld [vmem:[%s1576_s28 + $0xe8] sm:$0xf0]  ;;  %v1192_v34 = vor.u32 %v1302_v29, %v1191_v28  ;;  %v1199_v40 = vld [vmem:[%s1576_s28 + $0xf0] sm:$0xf]  ;;  %v1304_v41 = vld [vmem:[%s1576_s28 + $0xf4] sm:$0xf0] }
  0x22   : > { %677 = vmatpush.bf16.msra.mxu1 %v1315_v11  ;;  %1429 = vmatpush.bf16.msra.mxu3 %v1315_v11  ;;  %v1180_v11 = vor.u32 %v1297_v6, %v1177_v7  ;;  %v1196_v35 = vor.u32 %v1301_v30, %v1193_v31  ;;  %v1303_v42 = vld [vmem:[%s1576_s28 + $0xf4] sm:$0xf]  ;;  %v1201_v43 = vld [vmem:[%s1576_s28 + $0xf8] sm:$0xf0]  ;;  %v1200_v46 = vor.u32 %v1304_v41, %v1199_v40 }
  0x23   : > { %v1204_v47 = vor.u32 %v1303_v42, %v1201_v43 }
  0x25   : > { %589 = vmatpush.bf16.msra.mxu0 %v1306_v12  ;;  %1422 = vmatpush.bf16.msra.mxu2 %v1306_v12  ;;  %v1119_v12 = vld [vmem:[%s1576_s28 + $0x50] sm:$0xf] }
  0x26   : > { %678 = vmatpush.bf16.msra.mxu1 %v1314_v13  ;;  %1430 = vmatpush.bf16.msra.mxu3 %v1314_v13  ;;  %v1284_v13 = vld [vmem:[%s1576_s28 + $0x54] sm:$0xf0] }
  0x27   : > { %v1120_v20 = vor.u32 %v1284_v13, %v1119_v12 }
  0x29   : > { %590 = vmatpush.bf16.msra.mxu0 %v1305_v14  ;;  %1423 = vmatpush.bf16.msra.mxu2 %v1305_v14  ;;  %v1283_v14 = vld [vmem:[%s1576_s28 + $0x54] sm:$0xf] }
  0x2a   : > { %679 = vmatpush.bf16.msra.mxu1 %v1313_v15  ;;  %1431 = vmatpush.bf16.msra.mxu3 %v1313_v15  ;;  %v1121_v15 = vld [vmem:[%s1576_s28 + $0x58] sm:$0xf0] }
  0x2b   : > { %v1124_v21 = vor.u32 %v1283_v14, %v1121_v15 }
  0x2c   : > { %591 = vmatmul.bf16.vlgmr.msra.gmra.mxu0 %v1080_v24  ;;  %631 = vmatmul.bf16.vlgmr.msra.gmra.mxu2 %v1144_v26  ;;  %v1127_v24 = vld [vmem:[%s1576_s28 + $0x60] sm:$0xf]  ;;  %v1285_v26 = vld [vmem:[%s1576_s28 + $0x64] sm:$0xf] }
  0x2d   : > { %680 = vmatmul.bf16.vlgmr.msra.gmra.mxu1 %v1084_v25  ;;  %720 = vmatmul.bf16.vlgmr.msra.gmra.mxu3 %v1148_v27  ;;  %v1286_v25 = vld [vmem:[%s1576_s28 + $0x64] sm:$0xf0]  ;;  %v1129_v27 = vld [vmem:[%s1576_s28 + $0x68] sm:$0xf0] }
  0x2e   : > { %v1128_v32 = vor.u32 %v1286_v25, %v1127_v24  ;;  %v1132_v33 = vor.u32 %v1285_v26, %v1129_v27 }
  0x3c   : > { %596 = vmatmul.bf16.gmra.mxu0 %v1088_v36  ;;  %636 = vmatmul.bf16.gmra.mxu2 %v1152_v38  ;;  %v1135_v36 = vld [vmem:[%s1576_s28 + $0x70] sm:$0xf]  ;;  %v1287_v38 = vld [vmem:[%s1576_s28 + $0x74] sm:$0xf] }
  0x3d   : > { %685 = vmatmul.bf16.gmra.mxu1 %v1092_v37  ;;  %725 = vmatmul.bf16.gmra.mxu3 %v1156_v39  ;;  %v1288_v37 = vld [vmem:[%s1576_s28 + $0x74] sm:$0xf0]  ;;  %v1137_v39 = vld [vmem:[%s1576_s28 + $0x78] sm:$0xf0] }
  0x3e   : > { %v1136_v44 = vor.u32 %v1288_v37, %v1135_v36  ;;  %v1140_v45 = vor.u32 %v1287_v38, %v1137_v39 }
  0x4c   : > { %601 = vmatmul.bf16.gmra.mxu0 %v1096_v48  ;;  %641 = vmatmul.bf16.gmra.mxu2 %v1160_v50  ;;  %v1651_v50 = vld [vmem:[%s1842_s2] ss:$0 sm:$0xff] }
  0x4d   : > { %690 = vmatmul.bf16.gmra.mxu1 %v1100_v49  ;;  %730 = vmatmul.bf16.gmra.mxu3 %v1164_v51 }
  0x5c   : > { %606 = vmatmul.bf16.gmra.mxu0 %v1104_v60  ;;  %646 = vmatmul.bf16.gmra.mxu2 %v1168_v62 }
  0x5d   : > { %695 = vmatmul.bf16.gmra.mxu1 %v1108_v61  ;;  %735 = vmatmul.bf16.gmra.mxu3 %v1172_v63 }
  0x6c   : > { %611 = vmatmul.bf16.gmra.mxu0 %v1112_v8  ;;  %651 = vmatmul.bf16.gmra.mxu2 %v1176_v10 }
  0x6d   : > { %700 = vmatmul.bf16.gmra.mxu1 %v1116_v9  ;;  %740 = vmatmul.bf16.gmra.mxu3 %v1180_v11 }
  0x7c   : > { %616 = vmatmul.bf16.gmra.mxu0 %v1120_v20  ;;  %656 = vmatmul.bf16.gmra.mxu2 %v1184_v22 }
  0x7d   : > { %705 = vmatmul.bf16.gmra.mxu1 %v1124_v21  ;;  %745 = vmatmul.bf16.gmra.mxu3 %v1188_v23 }
  0x8c   : > { %621 = vmatmul.bf16.gmra.mxu0 %v1128_v32  ;;  %661 = vmatmul.bf16.gmra.mxu2 %v1192_v34 }
  0x8d   : > { %710 = vmatmul.bf16.gmra.mxu1 %v1132_v33  ;;  %750 = vmatmul.bf16.gmra.mxu3 %v1196_v35 }
  0x9c   : > { %626 = vmatmul.bf16.gmra.mxu0 %v1136_v44  ;;  %666 = vmatmul.bf16.gmra.mxu2 %v1200_v46 }
  0x9d   : > { %715 = vmatmul.bf16.gmra.mxu1 %v1140_v45  ;;  %755 = vmatmul.bf16.gmra.mxu3 %v1204_v47 }
  0xa9   : > { %v592_v48 = vpop.f32.mrf.mxu0 }
  0xaa   : > { %v681_v49 = vpop.f32.mrf.mxu1  ;;  %v593_v51 = vadd.f32 %v1651_v50, %v592_v48 }
  0xac   : > { %v682_v56 = vadd.f32 %v681_v49, %v593_v51 }
  0xae   : > { %v862_v60 = vmul.f32 %v682_v56, %v682_v56 }
  0xaf   : > { %v632_v52 = vpop.f32.mrf.mxu2 }
  0xb0   : > { %v721_v53 = vpop.f32.mrf.mxu3  ;;  %v633_v59 = vadd.f32 %v1651_v50, %v632_v52 }
  0xb1   : > { %v594_v54 = vpop.f32.mrf.mxu0 }
  0xb2   : > { %v683_v55 = vpop.f32.mrf.mxu1  ;;  %v595_v57 = vadd.f32 %v1651_v50, %v594_v54  ;;  %v1663_v5 = vadd.f32 %v721_v53, %v633_v59 }
  0xb4   : > { %v684_v58 = vadd.f32 %v683_v55, %v595_v57 }
  0xb6   : > { %v1324_v61 = vpack.c.bf16 %v684_v58, %v682_v56  ;;  %v825_v62 = vadd.f32 %v684_v58, %v682_v56  ;;  %v863_v63 = vmul.f32 %v684_v58, %v684_v58 }
  0xb7   : > { %v634_v1 = vpop.f32.mrf.mxu2 }
  0xb8   : > { %1325 = vst [vmem:[%s1659_s12] sm:$0xff] %v1324_v61   ;;  %v894_v0 = vadd.f32 %v863_v63, %v862_v60  ;;  %v723_v2 = vpop.f32.mrf.mxu3  ;;  %v635_v6 = vadd.f32 %v1651_v50, %v634_v1 }
  0xb9   : > { %v597_v3 = vpop.f32.mrf.mxu0 }
  0xba   : > { %v686_v4 = vpop.f32.mrf.mxu1  ;;  %v598_v7 = vadd.f32 %v1651_v50, %v597_v3  ;;  %v1667_v8 = vadd.f32 %v723_v2, %v635_v6 }
  0xbc   : > { %v687_v9 = vadd.f32 %v686_v4, %v598_v7  ;;  %v1364_v10 = vpack.c.bf16 %v1667_v8, %v1663_v5 }
  0xbe   : > { %v826_v11 = vadd.f32 %v825_v62, %v687_v9  ;;  %v864_v12 = vmul.f32 %v687_v9, %v687_v9  ;;  %1408 = vst [vmem:[%s1659_s12 + $0x40] sm:$0xff] %v1364_v10  }
  0xbf   : > { %v637_v14 = vpop.f32.mrf.mxu2 }
  0xc0   : > { %v895_v13 = vadd.f32 %v894_v0, %v864_v12  ;;  %v726_v15 = vpop.f32.mrf.mxu3  ;;  %v638_v20 = vadd.f32 %v1651_v50, %v637_v14 }
  0xc1   : > { %v599_v16 = vpop.f32.mrf.mxu0 }
  0xc2   : > { %v688_v17 = vpop.f32.mrf.mxu1  ;;  %v600_v18 = vadd.f32 %v1651_v50, %v599_v16  ;;  %v1679_v29 = vadd.f32 %v726_v15, %v638_v20 }
  0xc4   : > { %v689_v19 = vadd.f32 %v688_v17, %v600_v18 }
  0xc6   : > { %v1329_v21 = vpack.c.bf16 %v689_v19, %v687_v9  ;;  %v1674_v22 = vadd.f32 %v826_v11, %v689_v19  ;;  %v865_v23 = vmul.f32 %v689_v19, %v689_v19 }
  0xc7   : > { %v639_v25 = vpop.f32.mrf.mxu2 }
  0xc8   : > { %1401 = vst [vmem:[%s1659_s12 + $0x8] sm:$0xff] %v1329_v21   ;;  %v1677_v24 = vadd.f32 %v895_v13, %v865_v23  ;;  %v728_v26 = vpop.f32.mrf.mxu3  ;;  %v640_v30 = vadd.f32 %v1651_v50, %v639_v25 }
  0xc9   : > { %v602_v27 = vpop.f32.mrf.mxu0 }
  0xca   : > { %v691_v28 = vpop.f32.mrf.mxu1  ;;  %v1682_v31 = vadd.f32 %v728_v26, %v640_v30  ;;  %v603_v33 = vadd.f32 %v1651_v50, %v602_v27 }
  0xcc   : > { %v1369_v32 = vpack.c.bf16 %v1682_v31, %v1679_v29  ;;  %v1689_v39 = vadd.f32 %v691_v28, %v603_v33 }
  0xce   : > { %1409 = vst [vmem:[%s1659_s12 + $0x48] sm:$0xff] %v1369_v32  }
  0xcf   : > { %v642_v34 = vpop.f32.mrf.mxu2 }
  0xd0   : > { %v731_v35 = vpop.f32.mrf.mxu3  ;;  %v643_v41 = vadd.f32 %v1651_v50, %v642_v34 }
  0xd1   : > { %v604_v36 = vpop.f32.mrf.mxu0 }
  0xd2   : > { %v693_v37 = vpop.f32.mrf.mxu1  ;;  %v605_v38 = vadd.f32 %v1651_v50, %v604_v36  ;;  %v1697_v47 = vadd.f32 %v731_v35, %v643_v41 }
  0xd4   : > { %v1691_v40 = vadd.f32 %v693_v37, %v605_v38 }
  0xd6   : > { %v1334_v42 = vpack.c.bf16 %v1691_v40, %v1689_v39 }
  0xd7   : > { %v644_v43 = vpop.f32.mrf.mxu2 }
  0xd8   : > { %1402 = vst [vmem:[%s1659_s12 + $0x10] sm:$0xff] %v1334_v42   ;;  %v733_v44 = vpop.f32.mrf.mxu3  ;;  %v645_v48 = vadd.f32 %v1651_v50, %v644_v43 }
  0xd9   : > { %v607_v45 = vpop.f32.mrf.mxu0 }
  0xda   : > { %v696_v46 = vpop.f32.mrf.mxu1  ;;  %v1700_v49 = vadd.f32 %v733_v44, %v645_v48  ;;  %v608_v52 = vadd.f32 %v1651_v50, %v607_v45 }
  0xdc   : > { %v1374_v51 = vpack.c.bf16 %v1700_v49, %v1697_v47  ;;  %v1707_v58 = vadd.f32 %v696_v46, %v608_v52  ;;  %v866_v52 = vmul.f32 %v1689_v39, %v1689_v39 }
  0xde   : > { %1410 = vst [vmem:[%s1659_s12 + $0x50] sm:$0xff] %v1374_v51  }
  0xdf   : > { %v647_v53 = vpop.f32.mrf.mxu2 }
  0xe0   : > { %v736_v54 = vpop.f32.mrf.mxu3  ;;  %v648_v60 = vadd.f32 %v1651_v50, %v647_v53 }
  0xe1   : > { %v609_v55 = vpop.f32.mrf.mxu0 }
  0xe2   : > { %v698_v56 = vpop.f32.mrf.mxu1  ;;  %v610_v57 = vadd.f32 %v1651_v50, %v609_v55  ;;  %v1715_v2 = vadd.f32 %v736_v54, %v648_v60  ;;  %v867_v54 = vmul.f32 %v1691_v40, %v1691_v40  ;;  %v828_v55 = vadd.f32 %v1674_v22, %v1689_v39 }
  0xe4   : > { %v1709_v59 = vadd.f32 %v698_v56, %v610_v57 }
  0xe6   : > { %v1339_v61 = vpack.c.bf16 %v1709_v59, %v1707_v58  ;;  %v869_v22 = vmul.f32 %v1709_v59, %v1709_v59 }
  0xe7   : > { %v649_v62 = vpop.f32.mrf.mxu2 }
  0xe8   : > { %1403 = vst [vmem:[%s1659_s12 + $0x18] sm:$0xff] %v1339_v61   ;;  %v738_v63 = vpop.f32.mrf.mxu3  ;;  %v650_v3 = vadd.f32 %v1651_v50, %v649_v62  ;;  %v897_v61 = vadd.f32 %v1677_v24, %v866_v52 }
  0xe9   : > { %v612_v0 = vpop.f32.mrf.mxu0 }
  0xea   : > { %v701_v1 = vpop.f32.mrf.mxu1  ;;  %v1718_v4 = vadd.f32 %v738_v63, %v650_v3  ;;  %v613_v7 = vadd.f32 %v1651_v50, %v612_v0  ;;  %v829_v0 = vadd.f32 %v828_v55, %v1691_v40 }
  0xec   : > { %v1379_v6 = vpack.c.bf16 %v1718_v4, %v1715_v2  ;;  %v702_v14 = vadd.f32 %v701_v1, %v613_v7  ;;  %v868_v1 = vmul.f32 %v1707_v58, %v1707_v58  ;;  %v830_v7 = vadd.f32 %v829_v0, %v1707_v58 }
  0xee   : > { %1411 = vst [vmem:[%s1659_s12 + $0x58] sm:$0xff] %v1379_v6   ;;  %v898_v6 = vadd.f32 %v897_v61, %v867_v54  ;;  %v870_v40 = vmul.f32 %v702_v14, %v702_v14 }
  0xef   : > { %v652_v9 = vpop.f32.mrf.mxu2 }
  0xf0   : > { %v741_v10 = vpop.f32.mrf.mxu3  ;;  %v653_v16 = vadd.f32 %v1651_v50, %v652_v9 }
  0xf1   : > { %v614_v11 = vpop.f32.mrf.mxu0 }
  0xf2   : > { %v703_v12 = vpop.f32.mrf.mxu1  ;;  %v615_v13 = vadd.f32 %v1651_v50, %v614_v11  ;;  %v1730_v23 = vadd.f32 %v741_v10, %v653_v16  ;;  %v899_v10 = vadd.f32 %v898_v6, %v868_v1  ;;  %v831_v11 = vadd.f32 %v830_v7, %v1709_v59 }
  0xf3   : > { %v878_v6 = vmul.f32 %v1663_v5, %v1663_v5 }
  0xf4   : > { %v1725_v15 = vadd.f32 %v703_v12, %v615_v13  ;;  %v900_v13 = vadd.f32 %v899_v10, %v869_v22  ;;  %v832_v16 = vadd.f32 %v831_v11, %v702_v14  ;;  %v879_v11 = vmul.f32 %v1667_v8, %v1667_v8 }
  0xf6   : > { %v1344_v17 = vpack.c.bf16 %v1725_v15, %v702_v14  ;;  %v833_v59 = vadd.f32 %v832_v16, %v1725_v15  ;;  %v880_v16 = vmul.f32 %v1679_v29, %v1679_v29 }
  0xf7   : > { %v654_v18 = vpop.f32.mrf.mxu2 }
  0xf8   : > { %1404 = vst [vmem:[%s1659_s12 + $0x20] sm:$0xff] %v1344_v17   ;;  %v743_v19 = vpop.f32.mrf.mxu3  ;;  %v655_v25 = vadd.f32 %v1651_v50, %v654_v18  ;;  %v871_v17 = vmul.f32 %v1725_v15, %v1725_v15 }
  0xf9   : > { %v617_v20 = vpop.f32.mrf.mxu0 }
  0xfa   : > { %v706_v21 = vpop.f32.mrf.mxu1  ;;  %v1733_v26 = vadd.f32 %v743_v19, %v655_v25  ;;  %v618_v28 = vadd.f32 %v1651_v50, %v617_v20 }
  0xfc   : > { %v1384_v27 = vpack.c.bf16 %v1733_v26, %v1730_v23  ;;  %v707_v36 = vadd.f32 %v706_v21, %v618_v28 }
  0xfe   : > { %1412 = vst [vmem:[%s1659_s12 + $0x60] sm:$0xff] %v1384_v27   ;;  %v901_v27 = vadd.f32 %v900_v13, %v870_v40  ;;  %v872_v28 = vmul.f32 %v707_v36, %v707_v36 }
  0xff   : > { %v657_v30 = vpop.f32.mrf.mxu2 }
 0x100   : > { %v746_v32 = vpop.f32.mrf.mxu3  ;;  %v658_v38 = vadd.f32 %v1651_v50, %v657_v30 }
 0x101   : > { %v619_v33 = vpop.f32.mrf.mxu0 }
 0x102   : > { %v708_v34 = vpop.f32.mrf.mxu1  ;;  %v620_v35 = vadd.f32 %v1651_v50, %v619_v33  ;;  %v1742_v46 = vadd.f32 %v746_v32, %v658_v38  ;;  %v902_v32 = vadd.f32 %v901_v27, %v871_v17  ;;  %v834_v33 = vadd.f32 %v833_v59, %v707_v36 }
 0x103   : > { %v883_v27 = vmul.f32 %v1700_v49, %v1700_v49 }
 0x104   : > { %v709_v37 = vadd.f32 %v708_v34, %v620_v35  ;;  %v903_v38 = vadd.f32 %v902_v32, %v872_v28  ;;  %v884_v28 = vmul.f32 %v1715_v2, %v1715_v2  ;;  %v885_v32 = vmul.f32 %v1718_v4, %v1718_v4 }
 0x106   : > { %v1349_v41 = vpack.c.bf16 %v709_v37, %v707_v36  ;;  %v873_v34 = vmul.f32 %v709_v37, %v709_v37 }
 0x107   : > { %v659_v42 = vpop.f32.mrf.mxu2 }
 0x108   : > { %1405 = vst [vmem:[%s1659_s12 + $0x28] sm:$0xff] %v1349_v41   ;;  %v748_v43 = vpop.f32.mrf.mxu3  ;;  %v660_v48 = vadd.f32 %v1651_v50, %v659_v42  ;;  %v835_v41 = vadd.f32 %v834_v33, %v709_v37 }
 0x109   : > { %v622_v44 = vpop.f32.mrf.mxu0 }
 0x10a   : > { %v711_v45 = vpop.f32.mrf.mxu1  ;;  %v1745_v51 = vadd.f32 %v748_v43, %v660_v48  ;;  %v623_v56 = vadd.f32 %v1651_v50, %v622_v44  ;;  %v904_v44 = vadd.f32 %v903_v38, %v873_v34 }
 0x10c   : > { %v1389_v53 = vpack.c.bf16 %v1745_v51, %v1742_v46  ;;  %v712_v39 = vadd.f32 %v711_v45, %v623_v56 }
 0x10e   : > { %1413 = vst [vmem:[%s1659_s12 + $0x68] sm:$0xff] %v1389_v53   ;;  %v874_v42 = vmul.f32 %v712_v39, %v712_v39  ;;  %v836_v45 = vadd.f32 %v835_v41, %v712_v39 }
 0x10f   : > { %v662_v57 = vpop.f32.mrf.mxu2 }
 0x110   : > { %v751_v60 = vpop.f32.mrf.mxu3  ;;  %v663_v24 = vadd.f32 %v1651_v50, %v662_v57  ;;  %v905_v54 = vadd.f32 %v904_v44, %v874_v42 }
 0x111   : > { %v624_v62 = vpop.f32.mrf.mxu0 }
 0x112   : > { %v713_v63 = vpop.f32.mrf.mxu1  ;;  %v625_v3 = vadd.f32 %v1651_v50, %v624_v62  ;;  %v1770_v21 = vadd.f32 %v751_v60, %v663_v24 }
 0x114   : > { %v714_v9 = vadd.f32 %v713_v63, %v625_v3 }
 0x116   : > { %v1354_v12 = vpack.c.bf16 %v714_v9, %v712_v39  ;;  %v875_v48 = vmul.f32 %v714_v9, %v714_v9  ;;  %v837_v55 = vadd.f32 %v836_v45, %v714_v9 }
 0x117   : > { %v664_v18 = vpop.f32.mrf.mxu2 }
 0x118   : > { %1406 = vst [vmem:[%s1659_s12 + $0x30] sm:$0xff] %v1354_v12   ;;  %v753_v58 = vpop.f32.mrf.mxu3  ;;  %v665_v25 = vadd.f32 %v1651_v50, %v664_v18  ;;  %v906_v60 = vadd.f32 %v905_v54, %v875_v48 }
 0x119   : > { %v627_v19 = vpop.f32.mrf.mxu0 }
 0x11a   : > { %v716_v20 = vpop.f32.mrf.mxu1  ;;  %v628_v30 = vadd.f32 %v1651_v50, %v627_v19  ;;  %v1775_v14 = vadd.f32 %v753_v58, %v665_v25  ;;  %v881_v58 = vmul.f32 %v1682_v31, %v1682_v31 }
 0x11c   : > { %v1394_v35 = vpack.c.bf16 %v1775_v14, %v1770_v21  ;;  %v717_v43 = vadd.f32 %v716_v20, %v628_v30  ;;  %v882_v20 = vmul.f32 %v1697_v47, %v1697_v47  ;;  %v891_v54 = vmul.f32 %v1775_v14, %v1775_v14 }
 0x11e   : > { %1414 = vst [vmem:[%s1659_s12 + $0x70] sm:$0xff] %v1394_v35   ;;  %v876_v56 = vmul.f32 %v717_v43, %v717_v43  ;;  %v838_v61 = vadd.f32 %v837_v55, %v717_v43 }
 0x11f   : > { %v667_v15 = vpop.f32.mrf.mxu2 }
 0x120   : > { %v756_v52 = vpop.f32.mrf.mxu3  ;;  %v668_v37 = vadd.f32 %v1651_v50, %v667_v15  ;;  %v907_v63 = vadd.f32 %v906_v60, %v876_v56  ;;  %v890_v15 = vmul.f32 %v1770_v21, %v1770_v21 }
 0x121   : > { %v629_v53 = vpop.f32.mrf.mxu0 }
 0x122   : > { %v630_v36 = vadd.f32 %v1651_v50, %v629_v53  ;;  %v718_v57 = vpop.f32.mrf.mxu1  ;;  %v757_v24 = vadd.f32 %v756_v52, %v668_v37 }
 0x124   : > { %v719_v62 = vadd.f32 %v718_v57, %v630_v36  ;;  %v892_v56 = vmul.f32 %v757_v24, %v757_v24 }
 0x126   : > { %v1359_v0 = vpack.c.bf16 %v719_v62, %v717_v43  ;;  %v839_v1 = vadd.f32 %v838_v61, %v719_v62  ;;  %v877_v3 = vmul.f32 %v719_v62, %v719_v62 }
 0x127   : > { %v669_v39 = vpop.f32.mrf.mxu2 }
 0x128   : > { %1407 = vst [vmem:[%s1659_s12 + $0x38] sm:$0xff] %v1359_v0   ;;  %v840_v7 = vadd.f32 %v839_v1, %v1663_v5  ;;  %v908_v22 = vadd.f32 %v907_v63, %v877_v3  ;;  %v758_v9 = vpop.f32.mrf.mxu3  ;;  %v670_v10 = vadd.f32 %v1651_v50, %v669_v39 }
 0x12a   : > { %v841_v40 = vadd.f32 %v840_v7, %v1667_v8  ;;  %v909_v12 = vadd.f32 %v908_v22, %v878_v6  ;;  %v759_v13 = vadd.f32 %v758_v9, %v670_v10 }
 0x12c   : > { %v842_v17 = vadd.f32 %v841_v40, %v1679_v29  ;;  %v910_v5 = vadd.f32 %v909_v12, %v879_v11  ;;  %v1399_v18 = vpack.c.bf16 %v759_v13, %v757_v24 }
 0x12e   : > { %v843_v19 = vadd.f32 %v842_v17, %v1682_v31  ;;  %v911_v50 = vadd.f32 %v910_v5, %v880_v16  ;;  %1415 = vst [vmem:[%s1659_s12 + $0x78] sm:$0xff] %v1399_v18  }
 0x130   : > { %v844_v8 = vadd.f32 %v843_v19, %v1697_v47  ;;  %v912_v25 = vadd.f32 %v911_v50, %v881_v58  ;;  %v886_v47 = vmul.f32 %v1730_v23, %v1730_v23 }
 0x132   : > { %v845_v29 = vadd.f32 %v844_v8, %v1700_v49  ;;  %v913_v59 = vadd.f32 %v912_v25, %v882_v20  ;;  %v887_v49 = vmul.f32 %v1733_v26, %v1733_v26 }
 0x134   : > { %v914_v30 = vadd.f32 %v913_v59, %v883_v27  ;;  %v846_v31 = vadd.f32 %v845_v29, %v1715_v2  ;;  %v888_v2 = vmul.f32 %v1742_v46, %v1742_v46 }
 0x136   : > { %v847_v33 = vadd.f32 %v846_v31, %v1718_v4  ;;  %v915_v34 = vadd.f32 %v914_v30, %v884_v28  ;;  %v889_v4 = vmul.f32 %v1745_v51, %v1745_v51 }
 0x138   : > { %v848_v35 = vadd.f32 %v847_v33, %v1730_v23  ;;  %v916_v38 = vadd.f32 %v915_v34, %v885_v32 }
 0x13a   : > { %v849_v41 = vadd.f32 %v848_v35, %v1733_v26  ;;  %v917_v42 = vadd.f32 %v916_v38, %v886_v47 }
 0x13c   : > { %v850_v43 = vadd.f32 %v849_v41, %v1742_v46  ;;  %v918_v44 = vadd.f32 %v917_v42, %v887_v49 }
 0x13e   : > { %v851_v45 = vadd.f32 %v850_v43, %v1745_v51  ;;  %v919_v48 = vadd.f32 %v918_v44, %v888_v2  ;;  %v893_v51 = vmul.f32 %v759_v13, %v759_v13 }
 0x140   : > { %v852_v23 = vadd.f32 %v851_v45, %v1770_v21  ;;  %v920_v52 = vadd.f32 %v919_v48, %v889_v4 }
 0x142   : > { %v921_v26 = vadd.f32 %v920_v52, %v890_v15  ;;  %v853_v53 = vadd.f32 %v852_v23, %v1775_v14 }
 0x144   : > { %v922_v46 = vadd.f32 %v921_v26, %v891_v54  ;;  %v854_v55 = vadd.f32 %v853_v53, %v757_v24 }
 0x146   : > { %v923_v36 = vadd.f32 %v922_v46, %v892_v56  ;;  %v855_v57 = vadd.f32 %v854_v55, %v759_v13 }
 0x148   : > { %v856_v60 = vrot.slane %v855_v57, 4  ;;  %v924_v61 = vadd.f32 %v923_v36, %v893_v51 }
 0x14a   : > { %v857_v62 = vadd.f32 %v856_v60, %v855_v57  ;;  %v925_v37 = vrot.slane %v924_v61, 4 }
 0x14c   : > { %v858_v63 = vrot.slane %v857_v62, 2  ;;  %v926_v21 = vadd.f32 %v925_v37, %v924_v61 }
 0x14e   : > { %v859_v0 = vadd.f32 %v858_v63, %v857_v62  ;;  %v927_v1 = vrot.slane %v926_v21, 2 }
 0x150   : > { %v860_v3 = vrot.slane %v859_v0, 1  ;;  %v928_v6 = vadd.f32 %v927_v1, %v926_v21 }
 0x152   : > { %v929_v7 = vrot.slane %v928_v6, 1  ;;  %v861_v14 = vadd.f32 %v860_v3, %v859_v0 }
 0x154   : > { %v930_v22 = vadd.f32 %v929_v7, %v928_v6 }
 0x156   : > { %v932_v39 = vsel %vm931_vm0, %v861_v14, %v930_v22 }
 0x157   : > { %v934_v9 = vsel %vm933_vm1, %v932_v39, 0.0 }
 0x158   : > { %935 = vst [vmem:[%s258_s20] sm:$0xff] %v934_v9 }
 0x159 PF: > { %s15_s17 = sadd.s32 1, %s1479_s17   ;;  %s1845_s15 = smov %s1475_s16 }
 0x15a   : > { %p12_p5 = scmp.ge.s32.totalorder %s15_s17, 4   ;;  %s1846_s16 = smov %s1848_s18 }
 0x15c   :  { %14 = sbr.rel (!%p12_p5) target bundleno = 2 (0x2), region = 74 }

</bundles_post_ra>
